<compile_context>
chip_gen: v7x
topology: tpu7x:2x2x1
jax: 0.10.0
libtpu: 0.0.40
codegen_flags: <defaults>
</compile_context>

<pallas_src>
import jax
import jax.numpy as jnp
from jax import lax
from jax.experimental import pallas as pl
from jax.experimental.pallas import tpu as pltpu


def _round_up(x, m):
    return ((x + m - 1) // m) * m


def _forward_self_kernel(x_ref, w_ref, b_ref, o_ref):
    # x_ref: (tile_t, n_neurons)  natural layout (contiguous HBM read)
    # w_ref: (n_hid, n_neurons)   resident every grid step
    # b_ref: (1, n_hid)           broadcasts over rows
    # o_ref: (tile_t, n_hid)      written straight into the (T, n_hid) output
    z = lax.dot_general(
        x_ref[...], w_ref[...],
        dimension_numbers=(((1,), (1,)), ((), ())),   # x @ W^T
        preferred_element_type=jnp.float32,
    )
    z = z + b_ref[...]
    o_ref[...] = jax.nn.sigmoid(z).astype(o_ref.dtype)


def forward_self(convolved_spikes, weight, bias, *, tile_t=8192):
    """sigmoid(convolved_spikes @ weight.T + bias) via a Pallas TPU kernel.

    convolved_spikes: (T, n_neurons)        (any float dtype; used as-is)
    weight:           (n_hid, n_neurons)    nn.Linear weight
    bias:             (n_hid,)              nn.Linear bias
    tile_t:           time-tile height (rows per grid step); clamped so the
                      double-buffered tiles fit a v7x-safe VMEM budget.
    returns:          (T, n_hid) float32
    """
    T, n_neurons = convolved_spikes.shape
    n_hid, n_in = weight.shape
    assert n_in == n_neurons

    x = convolved_spikes                                   # natural layout
    w = weight if weight.dtype == x.dtype else weight.astype(x.dtype)
    b2d = bias.reshape(1, n_hid).astype(jnp.float32)

    itemsize = jnp.dtype(x.dtype).itemsize
    # VMEM footprint per tile row (lane dims pad to 128 in VMEM).
    row_bytes = _round_up(n_neurons, 128) * itemsize + _round_up(n_hid, 128) * 4

    VMEM_CAP = 32 * 1024 * 1024     # scoped cap, safe on v7x (64 MiB/TC) too
    HEADROOM = 4 * 1024 * 1024
    max_rows = (VMEM_CAP - HEADROOM) // (2 * row_bytes)    # 2 = double buffer
    max_tile = max(128, (max_rows // 128) * 128)

    if T <= 256:
        # Single full-extent block (exempt from the (8,128) rule): no tiling
        # overhead at demo scale.
        eff_tile = T
    else:
        eff_tile = max(128, (tile_t // 128) * 128)
        eff_tile = min(eff_tile, max_tile)
        # Keep >= 2 grid steps (feeds both v7x TensorCores) and balance the
        # ragged last block.
        half = _round_up(-(-T // 2), 128)
        eff_tile = min(eff_tile, half)

    grid = (pl.cdiv(T, eff_tile),)

    vmem_need = (2 * _round_up(eff_tile, 8) * row_bytes                 # x+out, 2 bufs
                 + _round_up(n_hid, 8) * _round_up(n_neurons, 128) * itemsize  # W
                 + 8 * _round_up(n_hid, 128) * 4)                       # bias
    vmem_limit = int(min(VMEM_CAP, vmem_need + HEADROOM))

    return pl.pallas_call(
        _forward_self_kernel,
        out_shape=jax.ShapeDtypeStruct((T, n_hid), jnp.float32),
        grid_spec=pltpu.PrefetchScalarGridSpec(
            num_scalar_prefetch=0,
            grid=grid,
            in_specs=[
                # time-tiled activations, full feature axis (contiguous DMA)
                pl.BlockSpec((eff_tile, n_neurons), lambda i: (i, 0)),
                # full weight matrix, resident every step
                pl.BlockSpec((n_hid, n_neurons), lambda i: (0, 0)),
                # bias row, resident every step
                pl.BlockSpec((1, n_hid), lambda i: (0, 0)),
            ],
            out_specs=pl.BlockSpec((eff_tile, n_hid), lambda i: (i, 0)),
        ),
        compiler_params=pltpu.CompilerParams(
            dimension_semantics=("parallel",),
            vmem_limit_bytes=vmem_limit,
        ),
    )(x, w, b2d)


if __name__ == "__main__":
    # Shapes consistent with the module:
    #   n_neurons = 32, n_vis_neurons = 24 -> n_hid_neurons = 8
    #   convolved_spikes: (n_time_bins, n_neurons) = (16, 32)
    n_neurons = 32
    n_vis_neurons = 24
    n_hid_neurons = n_neurons - n_vis_neurons
    n_time_bins = 16

    key = jax.random.PRNGKey(0)
    kx, kw, kb, kx2, kx3 = jax.random.split(key, 5)

    # Deterministic nn.Linear-style init: U(-1/sqrt(in), 1/sqrt(in))
    bound = 1.0 / (n_neurons ** 0.5)
    weight = jax.random.uniform(
        kw, (n_hid_neurons, n_neurons), minval=-bound, maxval=bound,
        dtype=jnp.float32,
    )
    bias = jax.random.uniform(
        kb, (n_hid_neurons,), minval=-bound, maxval=bound, dtype=jnp.float32
    )

    def ref_fn(x):
        return jax.nn.sigmoid(x @ weight.T + bias)

    # 1) Demo-scale path (single full-extent block, no tiling/padding).
    x_small = jax.random.normal(kx, (n_time_bins, n_neurons), dtype=jnp.float32)
    out = jax.block_until_ready(forward_self(x_small, weight, bias))
    assert out.shape == (n_time_bins, n_hid_neurons)
    assert jnp.allclose(out, ref_fn(x_small), atol=1e-5, rtol=1e-5)

    # 2) Ragged tiled path: T=1000 -> 2 parallel grid steps, last block only
    #    partially valid (masked stores, no jnp.pad, no wrapper transposes).
    x_mid = jax.random.normal(kx2, (1000, n_neurons), dtype=jnp.float32)
    out_mid = jax.block_until_ready(forward_self(x_mid, weight, bias))
    assert out_mid.shape == (1000, n_hid_neurons)
    assert jnp.allclose(out_mid, ref_fn(x_mid), atol=1e-5, rtol=1e-5)

    # 3) Large-T path exercising the big default tile (8192 rows, 3 grid
    #    steps, ragged tail).
    x_big = jax.random.normal(kx3, (20000, n_neurons), dtype=jnp.float32)
    out_big = jax.block_until_ready(forward_self(x_big, weight, bias))
    assert out_big.shape == (20000, n_hid_neurons)
    assert jnp.allclose(out_big, ref_fn(x_big), atol=1e-5, rtol=1e-5)

    print("KERNEL_OK")
</pallas_src>

<mosaic_0001>
module attributes {stable_mosaic.version = 11 : i64} {
  func.func @_forward_self_kernel(%arg0: i32, %arg1: memref<16x32xf32, #tpu.memory_space<vmem>>, %arg2: memref<8x32xf32, #tpu.memory_space<vmem>>, %arg3: memref<1x8xf32, #tpu.memory_space<vmem>>, %arg4: memref<16x8xf32, #tpu.memory_space<vmem>>) attributes {dimension_semantics = [#tpu.dimension_semantics<parallel>], iteration_bounds = array<i64: 1>, scalar_prefetch = 0 : i64, scratch_operands = 0 : i64, tpu.core_type = #tpu.core_type<tc>, window_params = [{transform_indices = @transform_0, window_bounds = array<i64: 16, 32>}, {pipeline_mode = #tpu.pipeline_mode<synchronous>, transform_indices = @transform_1, window_bounds = array<i64: 8, 32>}, {pipeline_mode = #tpu.pipeline_mode<synchronous>, transform_indices = @transform_2, window_bounds = array<i64: 1, 8>}, {transform_indices = @transform_3, window_bounds = array<i64: 16, 8>}]} {
    %c0 = arith.constant 0 : index
    %c0_0 = arith.constant 0 : index
    %0 = vector.load %arg1[%c0, %c0_0] : memref<16x32xf32, #tpu.memory_space<vmem>>, vector<16x32xf32>
    %c0_1 = arith.constant 0 : index
    %c0_2 = arith.constant 0 : index
    %1 = vector.load %arg2[%c0_1, %c0_2] : memref<8x32xf32, #tpu.memory_space<vmem>>, vector<8x32xf32>
    %cst = arith.constant dense<0.000000e+00> : vector<16x8xf32>
    %2 = tpu.matmul %0, %1, %cst {dimension_numbers = #tpu.dot_dimension_numbers<[1], [1], [0], [0], [0, 0, 1, 0], [], []>} : vector<16x32xf32>, vector<8x32xf32>, vector<16x8xf32> -> vector<16x8xf32>
    %c0_3 = arith.constant 0 : index
    %c0_4 = arith.constant 0 : index
    %3 = vector.load %arg3[%c0_3, %c0_4] : memref<1x8xf32, #tpu.memory_space<vmem>>, vector<1x8xf32>
    %4 = vector.broadcast %3 : vector<1x8xf32> to vector<16x8xf32>
    %5 = arith.addf %2, %4 : vector<16x8xf32>
    %6 = arith.negf %5 : vector<16x8xf32>
    %7 = math.exp %6 : vector<16x8xf32>
    %cst_5 = arith.constant 1.000000e+00 : f32
    %8 = vector.broadcast %cst_5 : f32 to vector<16x8xf32>
    %9 = arith.addf %8, %7 : vector<16x8xf32>
    %10 = arith.divf %8, %9 : vector<16x8xf32>
    %c0_6 = arith.constant 0 : index
    %c0_7 = arith.constant 0 : index
    %11 = vector.load %arg4[%c0_6, %c0_7] : memref<16x8xf32, #tpu.memory_space<vmem>>, vector<16x8xf32>
    tpu.vector_store %arg4[%c0_6, %c0_7], %10 {strides = array<i32>} : memref<16x8xf32, #tpu.memory_space<vmem>>, vector<16x8xf32>,
    return
  }
  func.func @transform_0(%arg0: i32) -> (i32, i32) {
    %c0_i32 = arith.constant 0 : i32
    %c0_i32_0 = arith.constant 0 : i32
    return %arg0, %c0_i32 : i32, i32
  }
  func.func @transform_1(%arg0: i32) -> (i32, i32) {
    %c0_i32 = arith.constant 0 : i32
    %c0_i32_0 = arith.constant 0 : i32
    %c0_i32_1 = arith.constant 0 : i32
    return %c0_i32, %c0_i32_0 : i32, i32
  }
  func.func @transform_2(%arg0: i32) -> (i32, i32) {
    %c0_i32 = arith.constant 0 : i32
    %c0_i32_0 = arith.constant 0 : i32
    %c0_i32_1 = arith.constant 0 : i32
    return %c0_i32, %c0_i32_0 : i32, i32
  }
  func.func @transform_3(%arg0: i32) -> (i32, i32) {
    %c0_i32 = arith.constant 0 : i32
    %c0_i32_0 = arith.constant 0 : i32
    return %arg0, %c0_i32 : i32, i32
  }
}

</mosaic_0001>

<bundles_post_ra>
// kernel: tpu_custom_call.1
= control target key start
LH: loop header
LB: loop body
LE: loop exit
PB: predicated region body
PF: predicated region fallthrough
CT: control target
= control target key end

     0   :  { %8 = vsyncpa [#allocation3], 0  ;;  %s287_s0 = inlined_call_operand.hbm [shape: f32[16,32], index: 0, kind: input, shape index: {}]   ;;  %s288_s1 = inlined_call_operand.hbm [shape: f32[8,32], index: 1, kind: input, shape index: {}]   ;;  %s289_s2 = inlined_call_operand.vmem [shape: f32[1,8], index: 2, kind: input, shape index: {}]   ;;  %s290_s3 = inlined_call_operand.vmem [shape: f32[16,8], index: 3, kind: output, shape index: {}]  }
   0x1   :  { %9 = vsyncpa [#allocation5], 0  ;;  %s230_s12 = smov [#allocation2]   ;;  %s182_s16 = scalar_lea.hbm %s287_s0, 256 }
   0x2   :  { %s15_s13 = sshll.u32 %s230_s12, 4  ;;  %p183_p0 = scmp.ne.s32.totalorder %s287_s0, %s182_s16  ;;  %s16_s13 = int_to_ptr.vmem [resolvable:$true] %s15_s13 }
   0x3   :  { %p186_p1 = scmp.lt.u32.totalorder %s182_s16, %s287_s0 }
   0x5   :  { %p188_p2 = pnand %p186_p1, %p183_p0 }
   0x7   :  { %191 = shalt.err (!%p188_p2)
}
   0x8   :  { %s192_s21 = scalar_lea.vmem %s16_s13, 256  ;;  %p197_p4 = scmp.lt.s32.totalorder %s16_s13, %s16_s13 }
   0x9   :  { %p193_p3 = scmp.ne.s32.totalorder %s16_s13, %s192_s21  ;;  %p198_p5 = scmp.lt.s32.totalorder %s192_s21, %s192_s21 }
   0xb   :  { %p199_p6 = por %p198_p5, %p197_p4 }
   0xd   :  { %p200_p7 = pnand %p199_p6, %p193_p3 }
   0xf   :  { %203 = shalt.err (!%p200_p7)
}
  0x10   :  { %s231_s22 = smov 128   ;;  %s232_s23 = smov 8  }
  0x11   :  { %21 = dma.hbm_to_vmem [thread:$0]  %s287_s0, 256, %s16_s13, [#allocation3], %s231_s22, %s231_s22, %s232_s23  }
  0x12   :  { %s233_s26 = smov [#allocation4]   ;;  %s204_s30 = scalar_lea.hbm %s288_s1, 128 }
  0x13   :  { %s28_s27 = sshll.u32 %s233_s26, 4  ;;  %p205_p8 = scmp.ne.s32.totalorder %s288_s1, %s204_s30  ;;  %s29_s27 = int_to_ptr.vmem [resolvable:$true] %s28_s27 }
  0x14   :  { %p208_p9 = scmp.lt.u32.totalorder %s204_s30, %s288_s1 }
  0x16   :  { %p210_p10 = pnand %p208_p9, %p205_p8 }
  0x18   :  { %213 = shalt.err (!%p210_p10)
}
  0x19   :  { %s214_s8 = scalar_lea.vmem %s29_s27, 128  ;;  %p219_p12 = scmp.lt.s32.totalorder %s29_s27, %s29_s27 }
  0x1a   :  { %p215_p11 = scmp.ne.s32.totalorder %s29_s27, %s214_s8  ;;  %p220_p13 = scmp.lt.s32.totalorder %s214_s8, %s214_s8 }
  0x1c   :  { %p221_p0 = por %p220_p13, %p219_p12 }
  0x1e   :  { %p222_p1 = pnand %p221_p0, %p215_p11 }
  0x20   :  { %225 = shalt.err (!%p222_p1)
}
  0x21   :  { %31 = dma.hbm_to_vmem [thread:$0]  %s288_s1, 128, %s29_s27, [#allocation5]  }
  0x22   :  { %226 = dma.done.wait [#allocation3], 256  }
  0x23   :  { %227 = vsyncadd [#allocation3], 4294967040 }
  0x24   :  { %228 = dma.done.wait [#allocation5], 128  }
  0x25   :  { %229 = vsyncadd [#allocation5], 4294967168  ;;  %vm50_vm0 = vcmask 261120   ;;  %v42_v0 = vld [vmem:[#allocation4] sm:$0xff]  ;;  %v40_v1 = vld [vmem:[#allocation2] sm:$0xff]  ;;  %vm147_vm1 = vcmask 64512  }
  0x26   :  { %165 = vmatprep.subr.msk.mxu0 %vm50_vm0, %v42_v0  ;;  %167 = vmatprep.mubr.msk.f32.mxu0 %vm50_vm0, %v40_v1  ;;  %v41_v2 = vld [vmem:[#allocation2 + $0x8] sm:$0xff]  ;;  %v156_v3 = vld [vmem:[%s289_s2] ss:$0 sm:$0xff] }
  0x27   :  { %166 = vmatpush3.xpose.msk.msra.mxu0 %vm50_vm0, %v42_v0 }
  0x2a   :  { %168 = vmatmul.mubr.msk.f32.vlgmr.msra.gmra.mrb[0].mxu0 %vm50_vm0, %v41_v2 }
  0xfd   :  { %v169_v4 = vpop.f32.mrb[0].mxu0 }
  0xfe   :  { %v132_v5 = vadd.f32 %v169_v4, %v156_v3  ;;  %v126_v6 = vpop.f32.mrb[1].mxu0 }
  0xff   :  { %v127_v7 = vadd.f32 %v156_v3, %v126_v6 }
 0x100   :  { %v161_v8 = vmul.f32 -1.442695, %v132_v5 }
 0x101   :  { %v160_v9 = vmul.f32 -1.442695, %v127_v7 }
 0x102   :  { %174 = vpow2.f32 %v161_v8 }
 0x103   :  { %176 = vpow2.f32 %v160_v9 }
 0x10c   :  { %v175_v10 = vpop.eup %174 }
 0x10d   :  { %v177_v11 = vpop.eup %176  ;;  %v142_v12 = vadd.f32 1.0, %v175_v10 }
 0x10e   :  { %v141_v13 = vadd.f32 1.0, %v177_v11 }
 0x10f   :  { %178 = vrcp.f32 %v142_v12 }
 0x110   :  { %180 = vrcp.f32 %v141_v13 }
 0x119   :  { %v179_v14 = vpop.eup %178 }
 0x11a   :  { %v181_v15 = vpop.eup %180  ;;  %149 = vst.msk [vmem:[%s290_s3 + $0x8] sm:$0xff] %vm147_vm1, %v179_v14 }
 0x11b   :  { %148 = vst.msk [vmem:[%s290_s3] sm:$0xff] %vm147_vm1, %v181_v15 }
 0x11c   :  { %154 = vsyncpa [#allocation3], 1 }
 0x11d   :  { %155 = vsyncpa [#allocation5], 1 }

</bundles_post_ra>
